<compile_context>
chip_gen: v7x
topology: tpu7x:2x2x1
jax: 0.10.0
libtpu: 0.0.40
codegen_flags: <defaults>
</compile_context>

<pallas_src>
import functools

import jax
import jax.numpy as jnp
import numpy as np
from jax.experimental import pallas as pl
from jax.experimental.pallas import tpu as pltpu


def _round_up(x, m):
    return (x + m - 1) // m * m


def gcn_stack_kernel(a_ref, w_ref, b_ref, x_hbm_ref, o_ref,
                     h_read, acc, seed_sem, *, tm, tk):
    """One grid step == (layer l, row tile r, contraction tile k).

    a_ref    : (tm, tk)    bf16 block of the normalized adjacency Â
    w_ref    : (1, Fp, Fp) bf16 per-layer weight, already [in, out]
    b_ref    : (1, 1, Fp)  f32  per-layer bias
    x_hbm_ref: (Np, Fp)    bf16 initial node features, left in HBM (pl.ANY)
    o_ref    : (Np, Fp)    f32  resident output block == write-side H
    h_read   : (Np, Fp)    bf16 read-side H (snapshot of previous layer)
    acc      : (tm, Fp)    f32  Â @ H accumulator for the current row tile
    seed_sem : (1,)        DMA semaphore for the one-shot x -> h_read copy
    """
    l = pl.program_id(0)   # layer (outer, sequential / carried)
    r = pl.program_id(1)   # Â row tile (sequential: carried state)
    k = pl.program_id(2)   # contraction tile over the node dimension
    nk = pl.num_programs(2)

    layer_start = jnp.logical_and(r == 0, k == 0)

    # Seed the read-side H <- x exactly once; x never occupies a per-step
    # double-buffered VMEM block.
    @pl.when(jnp.logical_and(l == 0, layer_start))
    def _():
        cp = pltpu.make_async_copy(x_hbm_ref, h_read, seed_sem.at[0])
        cp.start()
        cp.wait()

    # Layer boundary: snapshot the previous layer's f32 result (held in the
    # resident output block) into the bf16 read-side buffer.  Within a layer
    # all reads hit h_read and all writes hit o_ref -> no RAW hazard across
    # row tiles.
    @pl.when(jnp.logical_and(l > 0, layer_start))
    def _():
        h_read[...] = o_ref[...].astype(jnp.bfloat16)

    # Contraction-tiled aggregation: acc += Â[r, k] @ H[k]  (bf16 MXU, f32 acc).
    @pl.when(k == 0)
    def _():
        acc[...] = jnp.zeros_like(acc)

    col0 = pl.multiple_of(k * tk, tk)
    acc[...] += jnp.dot(a_ref[...], h_read[pl.ds(col0, tk), :],
                        preferred_element_type=jnp.float32)

    # Last contraction tile: apply the (pre-transposed) layer weight and bias,
    # write the f32 row tile into the resident output block (write-side H).
    @pl.when(k == nk - 1)
    def _():
        new_tile = jnp.dot(acc[...].astype(jnp.bfloat16), w_ref[0],
                           preferred_element_type=jnp.float32) + b_ref[0]
        row0 = pl.multiple_of(r * tm, tm)
        o_ref[pl.ds(row0, tm), :] = new_tile


def graph_model_forward(x, a_norm, weights, biases, *, tile=512):
    """x: [N, F] f32, a_norm: [N, N] f32,
    weights: [L, F, F] ([out, in] per layer, PyTorch Linear convention),
    biases: [L, 1, F] f32.  Returns [N, F] f32."""
    N, F = x.shape
    L = weights.shape[0]

    # Lane-dense feature dim; node dim padded to a multiple of 128 and of the
    # (shared) row/contraction tile so every block is (8,128)-aligned.
    Fp = _round_up(F, 128)
    base = _round_up(N, 128)
    tm = tk = min(tile, base)
    Np = _round_up(base, tm)
    num_row_tiles = Np // tm
    num_k_tiles = Np // tk

    # Pad + pre-cast once on the XLA side (not per grid step):
    #   Â, x -> bf16; W -> bf16 pre-transposed to [in, out]; bias stays f32.
    x_p = jnp.zeros((Np, Fp), jnp.bfloat16).at[:N, :F].set(x.astype(jnp.bfloat16))
    a_p = jnp.zeros((Np, Np), jnp.bfloat16).at[:N, :N].set(a_norm.astype(jnp.bfloat16))
    w_p = jnp.zeros((L, Fp, Fp), jnp.bfloat16).at[:, :F, :F].set(
        jnp.transpose(weights, (0, 2, 1)).astype(jnp.bfloat16))
    b_p = jnp.zeros((L, 1, Fp), jnp.float32).at[:, :, :F].set(biases.astype(jnp.float32))

    # VMEM budget: double-buffered streamed blocks + resident output + scratch.
    est = (2 * tm * tk * 2          # Â blocks (bf16, double-buffered)
           + 2 * Fp * Fp * 2        # per-layer W (bf16)
           + 2 * 8 * Fp * 4         # per-layer bias (f32, padded tile)
           + 2 * Np * Fp * 4        # resident output block (f32, be generous)
           + Np * Fp * 2            # read-side H (bf16)
           + tm * Fp * 4)           # f32 accumulator
    try:
        vmem_cap = int(pltpu.get_tpu_info().vmem_capacity_bytes)
    except Exception:
        vmem_cap = 64 * 1024 * 1024   # conservative (v7x per-core VMEM)
    vmem_limit = int(min(max(2 * est, 32 * 1024 * 1024), (vmem_cap * 7) // 8))

    grid_spec = pltpu.PrefetchScalarGridSpec(
        num_scalar_prefetch=0,
        grid=(L, num_row_tiles, num_k_tiles),                   # (layer, row, contraction)
        in_specs=[
            pl.BlockSpec((tm, tk), lambda l, r, k: (r, k)),        # Â block (bf16)
            pl.BlockSpec((1, Fp, Fp), lambda l, r, k: (l, 0, 0)),  # per-layer W [in,out]
            pl.BlockSpec((1, 1, Fp), lambda l, r, k: (l, 0, 0)),   # per-layer bias
            pl.BlockSpec(memory_space=pl.ANY),                     # x stays in HBM
        ],
        # Resident output block: written back to HBM exactly once at grid end;
        # doubles as the write-side H between layers.
        out_specs=pl.BlockSpec((Np, Fp), lambda l, r, k: (0, 0)),
        scratch_shapes=[
            pltpu.VMEM((Np, Fp), jnp.bfloat16),   # read-side H
            pltpu.VMEM((tm, Fp), jnp.float32),    # Â @ H accumulator
            pltpu.SemaphoreType.DMA((1,)),        # one-shot x -> h_read seed DMA
        ],
    )

    out_p = pl.pallas_call(
        functools.partial(gcn_stack_kernel, tm=tm, tk=tk),
        out_shape=jax.ShapeDtypeStruct((Np, Fp), jnp.float32),
        grid_spec=grid_spec,
        compiler_params=pltpu.CompilerParams(
            # All axes sequential: H is carried in VMEM (resident output +
            # read scratch) across layers, row tiles and contraction tiles.
            dimension_semantics=("arbitrary", "arbitrary", "arbitrary"),
            vmem_limit_bytes=vmem_limit,
        ),
    )(a_p, w_p, b_p, x_p)

    return out_p[:N, :F]


def build_gcn_adjacency(edge_index, num_nodes):
    """Dense Â = D^{-1/2} (A + I) D^{-1/2}, matching PyG gcn_norm defaults.
    Duplicate directed edges accumulate (scatter-add), like PyG."""
    src = edge_index[0]
    dst = edge_index[1]
    a = jnp.zeros((num_nodes, num_nodes), jnp.float32)
    a = a.at[dst, src].add(1.0)                           # messages src -> dst
    a = a + jnp.eye(num_nodes, dtype=jnp.float32)         # add self-loops
    deg = a.sum(axis=1)
    d_inv_sqrt = jnp.where(deg > 0, jax.lax.rsqrt(deg), 0.0)
    return d_inv_sqrt[:, None] * a * d_inv_sqrt[None, :]


def reference_forward_f32(x, a_norm, weights, biases):
    h = x
    for l in range(weights.shape[0]):
        h = a_norm @ (h @ weights[l].T) + biases[l, 0]
    return h


def reference_forward_mixed(x, a_norm, weights, biases):
    """Same mixed precision AND fusion order as the kernel:
    (Â @ H) @ W^T with bf16 MXU operands, f32 accumulation, f32 carry."""
    a16 = a_norm.astype(jnp.bfloat16)
    h = x.astype(jnp.float32)
    for l in range(weights.shape[0]):
        ah = jnp.dot(a16, h.astype(jnp.bfloat16),
                     preferred_element_type=jnp.float32)
        w16 = weights[l].T.astype(jnp.bfloat16)           # [in, out]
        h = jnp.dot(ah.astype(jnp.bfloat16), w16,
                    preferred_element_type=jnp.float32) + biases[l, 0]
    return h


if __name__ == "__main__":
    N = 16            # number of graph nodes
    F = 32            # in_features (GCNConv keeps feature dim)
    L = 3             # layer_num
    E = 24            # undirected edges (symmetrized below -> 48 directed)

    key = jax.random.PRNGKey(0)
    k_x, k_src, k_off, k_w = jax.random.split(key, 4)

    # node features
    x = jax.random.normal(k_x, (N, F), dtype=jnp.float32)

    # random edge list with no self-loops; symmetrize (undirected graph)
    src = jax.random.randint(k_src, (E,), 0, N)
    off = jax.random.randint(k_off, (E,), 1, N)
    dst = (src + off) % N
    edge_index = jnp.stack(
        [jnp.concatenate([src, dst]), jnp.concatenate([dst, src])], axis=0
    ).astype(jnp.int32)  # [2, 2E]

    # deterministic parameter init (glorot-ish weights, zero bias like PyG)
    wkeys = jax.random.split(k_w, L)
    scale = 1.0 / np.sqrt(F)
    weights = jnp.stack(
        [jax.random.uniform(wk, (F, F), jnp.float32, -scale, scale) for wk in wkeys]
    )                                    # [L, F, F]  ([out, in] per layer)
    biases = jnp.zeros((L, 1, F), jnp.float32)

    a_norm = build_gcn_adjacency(edge_index, N)

    out = graph_model_forward(x, a_norm, weights, biases)
    out = jax.block_until_ready(out)

    ref_mixed = reference_forward_mixed(x, a_norm, weights, biases)
    ref_f32 = reference_forward_f32(x, a_norm, weights, biases)

    # tight check vs. a reference using the kernel's mixed precision / fusion ...
    np.testing.assert_allclose(np.asarray(out), np.asarray(ref_mixed),
                               rtol=1e-2, atol=1e-2)
    # ... and a looser sanity check vs. the pure-f32 module semantics
    np.testing.assert_allclose(np.asarray(out), np.asarray(ref_f32),
                               rtol=5e-2, atol=5e-2)

    print("KERNEL_OK")
</pallas_src>

<mosaic_0001>
module attributes {stable_mosaic.version = 11 : i64} {
  func.func @gcn_stack_kernel(%arg0: i32, %arg1: i32, %arg2: i32, %arg3: memref<128x128xbf16, #tpu.memory_space<vmem>>, %arg4: memref<1x128x128xbf16, #tpu.memory_space<vmem>>, %arg5: memref<1x1x128xf32, #tpu.memory_space<vmem>>, %arg6: memref<128x128xbf16, #tpu.memory_space<any>>, %arg7: memref<128x128xf32, #tpu.memory_space<vmem>>, %arg8: memref<128x128xbf16, #tpu.memory_space<vmem>>, %arg9: memref<128x128xf32, #tpu.memory_space<vmem>>, %arg10: memref<1x!tpu.dma_semaphore, #tpu.memory_space<semaphore_mem>>) attributes {dimension_semantics = [#tpu.dimension_semantics<arbitrary>, #tpu.dimension_semantics<arbitrary>, #tpu.dimension_semantics<arbitrary>], iteration_bounds = array<i64: 3, 1, 1>, scalar_prefetch = 0 : i64, scratch_operands = 3 : i64, tpu.core_type = #tpu.core_type<tc>, window_params = [{transform_indices = @transform_0, window_bounds = array<i64: 128, 128>}, {transform_indices = @transform_1, window_bounds = array<i64: 1, 128, 128>}, {transform_indices = @transform_2, window_bounds = array<i64: 1, 1, 128>}, {}, {pipeline_mode = #tpu.pipeline_mode<synchronous>, transform_indices = @transform_4, window_bounds = array<i64: 128, 128>}]} {
    %c0_i32 = arith.constant 0 : i32
    %0 = arith.cmpi eq, %arg1, %c0_i32 : i32
    %c0_i32_0 = arith.constant 0 : i32
    %1 = arith.cmpi eq, %arg2, %c0_i32_0 : i32
    %2 = arith.andi %0, %1 : i1
    %c0_i32_1 = arith.constant 0 : i32
    %3 = arith.cmpi eq, %arg0, %c0_i32_1 : i32
    %4 = arith.andi %3, %2 : i1
    %5 = arith.extui %4 : i1 to i32
    %c0_i32_2 = arith.constant 0 : i32
    %6 = arith.cmpi ne, %5, %c0_i32_2 : i32
    scf.if %6 {
      %c0_i32_15 = arith.constant 0 : i32
      %26 = tpu.memref_slice %arg10[%c0_i32_15] : memref<1x!tpu.dma_semaphore, #tpu.memory_space<semaphore_mem>> -> memref<1x!tpu.dma_semaphore, #tpu.memory_space<semaphore_mem>>
      %27 = tpu.memref_squeeze %26 : memref<1x!tpu.dma_semaphore, #tpu.memory_space<semaphore_mem>> -> memref<!tpu.dma_semaphore, #tpu.memory_space<semaphore_mem>>
      tpu.enqueue_dma source(%arg6 : memref<128x128xbf16, #tpu.memory_space<any>>) target(%arg8 : memref<128x128xbf16, #tpu.memory_space<vmem>>) target_semaphore(%27 : memref<!tpu.dma_semaphore, #tpu.memory_space<semaphore_mem>>)
      %c0_i32_16 = arith.constant 0 : i32
      %28 = tpu.memref_slice %arg10[%c0_i32_16] : memref<1x!tpu.dma_semaphore, #tpu.memory_space<semaphore_mem>> -> memref<1x!tpu.dma_semaphore, #tpu.memory_space<semaphore_mem>>
      %29 = tpu.memref_squeeze %28 : memref<1x!tpu.dma_semaphore, #tpu.memory_space<semaphore_mem>> -> memref<!tpu.dma_semaphore, #tpu.memory_space<semaphore_mem>>
      tpu.wait_dma2 semaphore(%29 : memref<!tpu.dma_semaphore, #tpu.memory_space<semaphore_mem>>) src(%arg6 : memref<128x128xbf16, #tpu.memory_space<any>>) dst(%arg8 : memref<128x128xbf16, #tpu.memory_space<vmem>>)
    } else {
    }
    %c0_i32_3 = arith.constant 0 : i32
    %7 = arith.cmpi sgt, %arg0, %c0_i32_3 : i32
    %8 = arith.andi %7, %2 : i1
    %9 = arith.extui %8 : i1 to i32
    %c0_i32_4 = arith.constant 0 : i32
    %10 = arith.cmpi ne, %9, %c0_i32_4 : i32
    scf.if %10 {
      %c0_15 = arith.constant 0 : index
      %c0_16 = arith.constant 0 : index
      %26 = vector.load %arg7[%c0_15, %c0_16] : memref<128x128xf32, #tpu.memory_space<vmem>>, vector<128x128xf32>
      %27 = arith.truncf %26 : vector<128x128xf32> to vector<128x128xbf16>
      %c0_17 = arith.constant 0 : index
      %c0_18 = arith.constant 0 : index
      %28 = vector.load %arg8[%c0_17, %c0_18] : memref<128x128xbf16, #tpu.memory_space<vmem>>, vector<128x128xbf16>
      tpu.vector_store %arg8[%c0_17, %c0_18], %27 {strides = array<i32>} : memref<128x128xbf16, #tpu.memory_space<vmem>>, vector<128x128xbf16>,
    } else {
    }
    %c0_i32_5 = arith.constant 0 : i32
    %11 = arith.cmpi eq, %arg2, %c0_i32_5 : i32
    %12 = arith.extui %11 : i1 to i32
    %c0_i32_6 = arith.constant 0 : i32
    %13 = arith.cmpi ne, %12, %c0_i32_6 : i32
    scf.if %13 {
      %cst_15 = arith.constant 0.000000e+00 : f32
      %26 = vector.broadcast %cst_15 : f32 to vector<128x128xf32>
      %c0_16 = arith.constant 0 : index
      %c0_17 = arith.constant 0 : index
      %27 = vector.load %arg9[%c0_16, %c0_17] : memref<128x128xf32, #tpu.memory_space<vmem>>, vector<128x128xf32>
      tpu.vector_store %arg9[%c0_16, %c0_17], %26 {strides = array<i32>} : memref<128x128xf32, #tpu.memory_space<vmem>>, vector<128x128xf32>,
    } else {
    }
    %c128_i32 = arith.constant 128 : i32
    %14 = arith.muli %arg2, %c128_i32 : i32
    %15 = tpu.assume_multiple %14, 128 : i32
    %c0 = arith.constant 0 : index
    %c0_7 = arith.constant 0 : index
    %16 = vector.load %arg9[%c0, %c0_7] : memref<128x128xf32, #tpu.memory_space<vmem>>, vector<128x128xf32>
    %c0_8 = arith.constant 0 : index
    %c0_9 = arith.constant 0 : index
    %17 = vector.load %arg3[%c0_8, %c0_9] : memref<128x128xbf16, #tpu.memory_space<vmem>>, vector<128x128xbf16>
    %18 = arith.index_cast %15 : i32 to index
    %c0_10 = arith.constant 0 : index
    %19 = vector.load %arg8[%18, %c0_10] : memref<128x128xbf16, #tpu.memory_space<vmem>>, vector<128x128xbf16>
    %cst = arith.constant dense<0.000000e+00> : vector<128x128xf32>
    %20 = tpu.matmul %17, %19, %cst {dimension_numbers = #tpu.dot_dimension_numbers<[1], [0], [0], [1], [0, 0, 1, 1], [], []>} : vector<128x128xbf16>, vector<128x128xbf16>, vector<128x128xf32> -> vector<128x128xf32>
    %21 = arith.addf %16, %20 : vector<128x128xf32>
    %c0_11 = arith.constant 0 : index
    %c0_12 = arith.constant 0 : index
    %22 = vector.load %arg9[%c0_11, %c0_12] : memref<128x128xf32, #tpu.memory_space<vmem>>, vector<128x128xf32>
    tpu.vector_store %arg9[%c0_11, %c0_12], %21 {strides = array<i32>} : memref<128x128xf32, #tpu.memory_space<vmem>>, vector<128x128xf32>,
    %c0_i32_13 = arith.constant 0 : i32
    %23 = arith.cmpi eq, %arg2, %c0_i32_13 : i32
    %24 = arith.extui %23 : i1 to i32
    %c0_i32_14 = arith.constant 0 : i32
    %25 = arith.cmpi ne, %24, %c0_i32_14 : i32
    scf.if %25 {
      %c0_15 = arith.constant 0 : index
      %c0_16 = arith.constant 0 : index
      %26 = vector.load %arg9[%c0_15, %c0_16] : memref<128x128xf32, #tpu.memory_space<vmem>>, vector<128x128xf32>
      %27 = arith.truncf %26 : vector<128x128xf32> to vector<128x128xbf16>
      %c0_17 = arith.constant 0 : index
      %c0_18 = arith.constant 0 : index
      %c0_19 = arith.constant 0 : index
      %28 = vector.load %arg4[%c0_17, %c0_18, %c0_19] : memref<1x128x128xbf16, #tpu.memory_space<vmem>>, vector<1x128x128xbf16>
      %29 = vector.shape_cast %28 : vector<1x128x128xbf16> to vector<128x128xbf16>
      %cst_20 = arith.constant dense<0.000000e+00> : vector<128x128xf32>
      %30 = tpu.matmul %27, %29, %cst_20 {dimension_numbers = #tpu.dot_dimension_numbers<[1], [0], [0], [1], [0, 0, 1, 1], [], []>} : vector<128x128xbf16>, vector<128x128xbf16>, vector<128x128xf32> -> vector<128x128xf32>
      %c0_21 = arith.constant 0 : index
      %c0_22 = arith.constant 0 : index
      %c0_23 = arith.constant 0 : index
      %31 = vector.load %arg5[%c0_21, %c0_22, %c0_23] : memref<1x1x128xf32, #tpu.memory_space<vmem>>, vector<1x1x128xf32>
      %32 = vector.shape_cast %31 : vector<1x1x128xf32> to vector<1x128xf32>
      %33 = vector.broadcast %32 : vector<1x128xf32> to vector<128x128xf32>
      %34 = arith.addf %30, %33 : vector<128x128xf32>
      %c128_i32_24 = arith.constant 128 : i32
      %35 = arith.muli %arg1, %c128_i32_24 : i32
      %36 = tpu.assume_multiple %35, 128 : i32
      %37 = arith.index_cast %36 : i32 to index
      %c0_25 = arith.constant 0 : index
      %38 = vector.load %arg7[%37, %c0_25] : memref<128x128xf32, #tpu.memory_space<vmem>>, vector<128x128xf32>
      tpu.vector_store %arg7[%37, %c0_25], %34 {strides = array<i32>} : memref<128x128xf32, #tpu.memory_space<vmem>>, vector<128x128xf32>,
    } else {
    }
    return
  }
  func.func @transform_0(%arg0: i32, %arg1: i32, %arg2: i32) -> (i32, i32) {
    %c0_i32 = arith.constant 0 : i32
    return %arg1, %arg2 : i32, i32
  }
  func.func @transform_1(%arg0: i32, %arg1: i32, %arg2: i32) -> (i32, i32, i32) {
    %c0_i32 = arith.constant 0 : i32
    %c0_i32_0 = arith.constant 0 : i32
    %c0_i32_1 = arith.constant 0 : i32
    return %arg0, %c0_i32, %c0_i32_0 : i32, i32, i32
  }
  func.func @transform_2(%arg0: i32, %arg1: i32, %arg2: i32) -> (i32, i32, i32) {
    %c0_i32 = arith.constant 0 : i32
    %c0_i32_0 = arith.constant 0 : i32
    %c0_i32_1 = arith.constant 0 : i32
    return %arg0, %c0_i32, %c0_i32_0 : i32, i32, i32
  }
  func.func @transform_4(%arg0: i32, %arg1: i32, %arg2: i32) -> (i32, i32) {
    %c0_i32 = arith.constant 0 : i32
    %c0_i32_0 = arith.constant 0 : i32
    %c0_i32_1 = arith.constant 0 : i32
    return %c0_i32, %c0_i32_0 : i32, i32
  }
}

</mosaic_0001>

<bundles_post_ra>
// kernel: tpu_custom_call.1
= control target key start
LH: loop header
LB: loop body
LE: loop exit
PB: predicated region body
PF: predicated region fallthrough
CT: control target
= control target key end

     0   :  { %9 = vsyncpa [#allocation6], 0  ;;  %s1532_s0 = inlined_call_operand.hbm [shape: bf16[128,128], index: 0, kind: input, shape index: {}]   ;;  %s1533_s1 = inlined_call_operand.hbm [shape: bf16[3,128,128], index: 1, kind: input, shape index: {}]   ;;  %s1534_s2 = inlined_call_operand.vmem [shape: f32[3,1,128], index: 2, kind: input, shape index: {}]   ;;  %s1535_s3 = inlined_call_operand.hbm [shape: bf16[128,128], index: 3, kind: input, shape index: {}]   ;;  %s1536_s4 = inlined_call_operand.hbm [shape: f32[128,128], index: 4, kind: output, shape index: {}]  }
   0x1   :  { %10 = vsyncpa [#allocation9], 0 }
   0x2   :  { %12 = vsyncpa [#allocation9 + $0x1], 0 }
   0x3   :  { %13 = vsyncpa [#allocation7], 0  ;;  %s1296_s15 = smov 0   ;;  %s1298_s16 = smov 0  }
   0x4   :  { %s1300_s17 = smov 0   ;;  %s1302_s18 = smov 0  }
   0x5   :  { %s1304_s19 = smov 0   ;;  %s1306_s20 = smov 0  }
   0x6 LB: > { %s860_s21 = sadd.s32 4294967295, %s1261_s20   ;;  %p86_p0 = scmp.ne.s32.totalorder %s1245_s16, %s1241_s15  ;;  %s1261_s20 = sphi %s1306_s20, %s19_s20   ;;  %s1257_s19 = sphi %s1304_s19, %s1554_s19   ;;  %s1253_s18 = sphi %s1302_s18, %s1553_s18   ;;  %s1249_s17 = sphi %s1300_s17, %s1552_s17   ;;  %s1245_s16 = sphi %s1298_s16, %s1551_s16   ;;  %s1241_s15 = sphi %s1296_s15, %s1550_s15  }
   0x7   : > { %p1328_p1 = scmp.eq.s32.totalorder %s860_s21, 0  ;;  %p861_p2 = scmp.ge.s32.totalorder %s1261_s20, 1 }
   0x8   : > { %p144_p3 = scmp.lt.s32.totalorder %s1261_s20, 4  ;;  %s1263_s25 = smov [#allocation5]  }
   0x9   : > { %s1541_s22 = scalar_select %p1328_p1, 1, 0 }
   0xa   : > { %p1336_p4 = por %p1328_p1, %p86_p0  ;;  %p1340_p5 = pnand %p861_p2, %p144_p3 }
   0xb   : > { %s160_s26 = sshll.u32 %s1263_s25, 4  ;;  %s38_s28 = sadd.s32 1, %s1257_s19  ;;  %s161_s26 = int_to_ptr.vmem [resolvable:$true] %s160_s26 }
   0xc   : > { %s1542_s23 = scalar_select %p1336_p4, 1, 0 }
   0xd   : > { %s1543_s24 = scalar_select %p1340_p5, 1, 0 }
   0xe   : > { %p1005_p6 = pneg %p1340_p5  ;;  %s1089_s5 = scalar_lea.hbm %s1532_s0, 1024 }
   0xf   : > { %p1090_p8 = scmp.ne.s32.totalorder %s1532_s0, %s1089_s5  ;;  %p1096_p12 = scmp.lt.u32.totalorder %s1089_s5, %s1532_s0 }
  0x10   : > { %p1348_p7 = pnand %p1005_p6, %p1328_p1 }
  0x12   : > { %p1091_p9 = pneg %p1348_p7 }
  0x14   : > { %p1092_p10 = pnand %p1091_p9, %p1090_p8 }
  0x16   : > { %p1093_p11 = pneg %p1092_p10 }
  0x18   : > { %p1098_p13 = pnand %p1096_p12, %p1093_p11 }
  0x1a   : > { %1101 = shalt.err (!%p1098_p13)
}
  0x1b   : > { %s1102_s10 = scalar_lea.vmem %s161_s26, 1024  ;;  %p1110_p6 = scmp.lt.s32.totalorder %s161_s26, %s161_s26 }
  0x1c   : > { %p1103_p0 = scmp.ne.s32.totalorder %s161_s26, %s1102_s10  ;;  %p1111_p4 = scmp.lt.s32.totalorder %s1102_s10, %s1102_s10 }
  0x1e   : > { %p1105_p2 = pnand %p1103_p0, %p1091_p9  ;;  %p1112_p1 = por %p1111_p4, %p1110_p6 }
  0x20   : > { %p1106_p3 = pneg %p1105_p2 }
  0x22   : > { %p1113_p5 = pnand %p1112_p1, %p1106_p3 }
  0x24   : > { %1116 = shalt.err (!%p1113_p5)
}
  0x25   : > { %s1264_s11 = smov 64   ;;  %s1265_s12 = smov 4  }
  0x26   : > { %1008 = dma.hbm_to_vmem [thread:$0]  (!%p1348_p7), %s1532_s0, 1024, %s161_s26, [#allocation6], %s1264_s11, %s1264_s11, %s1265_s12  }
  0x27   : > { %p40_p1 = scmp.ge.s32.totalorder %s38_s28, 3  ;;  %s73_s15 = sadd.s32 1, %s1249_s17 }
  0x28   : > { %p80_p4 = scmp.ne.s32.totalorder %s1249_s17, %s1245_s16  ;;  %p81_p5 = scmp.eq.s32.totalorder %s1261_s20, 0 }
  0x29   : > { %s1556_s28 = smov (%p40_p1, %s38_s28), 0  ;;  %p1014_p9 = scmp.lt.s32.totalorder %s1261_s20, 3 }
  0x2a   : > { %p82_p8 = por %p81_p5, %p80_p4  ;;  %s70_s25 = ssub.s32 %s1257_s19, %s1556_s28 }
  0x2b   : > { %s174_s29 = sand.u32 1, %s1249_s17   ;;  %p71_p10 = scmp.eq.s32.totalorder %s70_s25, 0 }
  0x2c   : > { %s864_s27 = sshll.u32 %s174_s29, 6  ;;  %s894_s30 = sshll.u32 %s1257_s19, 10 }
  0x2d   : > { %s1384_s5 = scalar_select %p71_p10, %s1249_s17, %s73_s15  }
  0x2e   : > { %s1389_s26 = scalar_lea.hbm %s1533_s1, %s894_s30  ;;  %s178_s8 = scalar_lea.vmem [#allocation8], %s864_s27 }
  0x2f   : > { %s185_s9 = sshll.u32 %s178_s8, 4  ;;  %p1391_p7 = pnand %p1014_p9, %p82_p8  ;;  %s1395_s9 = int_to_ptr.vmem [resolvable:$true] %s185_s9 }
  0x30   : > { %s1397_s13 = scalar_lea.sflag [#allocation9], %s174_s29  ;;  %s1117_s14 = scalar_lea.hbm %s1389_s26, 1024 }
  0x31   : > { %p1118_p11 = scmp.ne.s32.totalorder %s1389_s26, %s1117_s14  ;;  %p1119_p12 = pneg %p1391_p7 }
  0x32   : > { %s1122_s27 = scalar_lea.hbm %s1533_s1, 3072  ;;  %p1123_p2 = scmp.lt.u32.totalorder %s1389_s26, %s1533_s1 }
  0x33   : > { %p1120_p13 = pnand %p1119_p12, %p1118_p11  ;;  %p1124_p3 = scmp.lt.u32.totalorder %s1122_s27, %s1117_s14 }
  0x34   : > { %p1126_p1 = scmp.lt.u32.totalorder %s1117_s14, %s1389_s26 }
  0x35   : > { %p1121_p0 = pneg %p1120_p13  ;;  %p1125_p6 = por %p1124_p3, %p1123_p2 }
  0x37   : > { %p1127_p4 = por %p1126_p1, %p1125_p6 }
  0x39   : > { %p1128_p5 = pnand %p1127_p4, %p1121_p0 }
  0x3b   : > { %1131 = shalt.err (!%p1128_p5)
}
  0x3c   : > { %s1132_s29 = scalar_lea.vmem %s1395_s9, 1024  ;;  %s1266_s7 = smov [#allocation8]  }
  0x3d   : > { %p1133_p8 = scmp.ne.s32.totalorder %s1395_s9, %s1132_s29  ;;  %s1137_s8 = sshll.u32 %s1266_s7, 4  ;;  %s1138_s8 = int_to_ptr.vmem [resolvable:$false] %s1137_s8 }
  0x3e   : > { %s1139_s15 = scalar_lea.vmem %s1138_s8, 2048  ;;  %p1140_p11 = scmp.lt.s32.totalorder %s1395_s9, %s1138_s8 }
  0x3f   : > { %p1135_p9 = pnand %p1133_p8, %p1119_p12  ;;  %p1141_p13 = scmp.lt.s32.totalorder %s1139_s15, %s1132_s29 }
  0x41   : > { %p1136_p10 = pneg %p1135_p9  ;;  %p1142_p2 = por %p1141_p13, %p1140_p11 }
  0x43   : > { %p1143_p3 = pnand %p1142_p2, %p1136_p10 }
  0x45   : > { %1146 = shalt.err (!%p1143_p3)
}
  0x46   : > { %1012 = dma.hbm_to_vmem [thread:$0]  (!%p1391_p7), %s1389_s26, 1024, %s1395_s9, %s1397_s13, %s1264_s11, %s1264_s11, %s1265_s12  }
  0x47   : > { %p1546_p12 = scmp.ne.s32.totalorder %s1543_s24, 0 }
  0x48   : > { %p1547_p0 = scmp.ne.s32.totalorder (!%p1546_p12), %s1541_s22, 0 }
  0x49   : > { %203 = sbr.rel (%p1546_p12) target bundleno = 629 (0x275), region = 32 }
  0x50   : > { %1224 = dma.done.wait (%p1547_p0), [#allocation6], 1024  }
  0x51   : > { %1226 = vsyncadd (%p1547_p0), [#allocation6], 4294966272  ;;  %s209_s14 = sand.u32 1, %s1245_s16   ;;  %p1548_p6 = scmp.ne.s32.totalorder %s1542_s23, 0 }
  0x52   : > { %s869_s10 = sshll.u32 %s209_s14, 6  ;;  %s210_s25 = scalar_lea.sflag [#allocation9], %s209_s14 }
  0x53   : > { %s1435_s27 = scalar_lea.vmem [#allocation8], %s869_s10 }
  0x54   : > { %1228 = dma.done.wait (%p1548_p6), %s210_s25, 1024  }
  0x55   : > { %1230 = vsyncadd (%p1548_p6), %s210_s25, 4294966272  ;;  %p235_p7 = scmp.lt.s32.totalorder %s1253_s18, 2  ;;  %p243_p1 = scmp.eq.s32.totalorder %s1253_s18, 0 }
  0x56   : > { %s1267_s24 = smov [#allocation2]   ;;  %s1147_s23 = scalar_lea.hbm %s1535_s3, 1024 }
  0x57   : > { %s1444_s22 = scalar_select %p235_p7, %s1253_s18, 2 }
  0x58   : > { %s255_s11 = sshll.u32 %s1267_s24, 4  ;;  %p1148_p4 = scmp.ne.s32.totalorder %s1535_s3, %s1147_s23  ;;  %s256_s11 = int_to_ptr.vmem [resolvable:$true] %s255_s11 }
  0x59   : > { %s237_s9 = scalar_lea.vmem %s1534_s2, %s1444_s22  ;;  %p1153_p9 = scmp.lt.u32.totalorder %s1147_s23, %s1535_s3 }
  0x5a   : > { %p1149_p5 = pnand %p1148_p4, %p243_p1 }
  0x5c   : > { %p1150_p8 = pneg %p1149_p5 }
  0x5e   : > { %p1155_p10 = pnand %p1153_p9, %p1150_p8 }
  0x60   : > { %1158 = shalt.err (!%p1155_p10)  }
  0x61   : > { %s1159_s15 = scalar_lea.vmem %s256_s11, 1024  ;;  %p1166_p3 = scmp.lt.s32.totalorder %s256_s11, %s256_s11 }
  0x62   : > { %p1160_p11 = scmp.ne.s32.totalorder %s256_s11, %s1159_s15  ;;  %p1167_p12 = scmp.lt.s32.totalorder %s1159_s15, %s1159_s15 }
  0x64   : > { %p1161_p13 = pnand %p1160_p11, %p243_p1  ;;  %p1168_p0 = por %p1167_p12, %p1166_p3 }
  0x66   : > { %p1162_p2 = pneg %p1161_p13 }
  0x68   : > { %p1169_p6 = pnand %p1168_p0, %p1162_p2 }
  0x6a   : > { %1172 = shalt.err (!%p1169_p6)  }
  0x6b   : > { %999 = dma.hbm_to_vmem [thread:$0]  (%p243_p1), %s1535_s3, 1024, %s256_s11, [#allocation4] }
  0x6c   : > { %1232 = dma.done.wait (%p243_p1), [#allocation4], 1024 }
  0x6d   : > { %1234 = vsyncadd (%p243_p1), [#allocation4], 4294966272  ;;  %p263_p7 = scmp.gt.s32.totalorder %s1253_s18, 0 }
  0x6e   : > { %v268_v0 = vld [vmem:[#allocation10] sm:$0xff] (%p263_p7)  ;;  %v269_v1 = vld [vmem:[#allocation10 + $0x8] sm:$0xff] (%p263_p7)  ;;  %v270_v2 = vld [vmem:[#allocation10 + $0x10] sm:$0xff] (%p263_p7) }
  0x6f   : > { %267 = sbr.rel (!%p263_p7) target bundleno = 119 (0x77), region = 52  ;;  %v284_v3 = vpack.c.bf16 (%p263_p7), %v269_v1, %v268_v0  ;;  %v271_v4 = vld [vmem:[#allocation10 + $0x18] sm:$0xff] (%p263_p7)  ;;  %v272_v5 = vld [vmem:[#allocation10 + $0x20] sm:$0xff] (%p263_p7)  ;;  %v273_v6 = vld [vmem:[#allocation10 + $0x28] sm:$0xff] (%p263_p7) }
  0x70   : > { %v285_v7 = vpack.c.bf16 (%p263_p7), %v271_v4, %v270_v2  ;;  %v286_v8 = vpack.c.bf16 (%p263_p7), %v273_v6, %v272_v5  ;;  %v274_v9 = vld [vmem:[#allocation10 + $0x30] sm:$0xff] (%p263_p7)  ;;  %v275_v10 = vld [vmem:[#allocation10 + $0x38] sm:$0xff] (%p263_p7)  ;;  %v276_v11 = vld [vmem:[#allocation10 + $0x40] sm:$0xff] (%p263_p7) }
  0x71   : > { %292 = vst [vmem:[#allocation2] sm:$0xff] (%p263_p7), %v284_v3  ;;  %v287_v12 = vpack.c.bf16 (%p263_p7), %v275_v10, %v274_v9  ;;  %v277_v13 = vld [vmem:[#allocation10 + $0x48] sm:$0xff] (%p263_p7)  ;;  %v278_v14 = vld [vmem:[#allocation10 + $0x50] sm:$0xff] (%p263_p7)  ;;  %v279_v15 = vld [vmem:[#allocation10 + $0x58] sm:$0xff] (%p263_p7) }
  0x72   : > { %293 = vst [vmem:[#allocation2 + $0x8] sm:$0xff] (%p263_p7), %v285_v7  ;;  %294 = vst [vmem:[#allocation2 + $0x10] sm:$0xff] (%p263_p7), %v286_v8  ;;  %v288_v16 = vpack.c.bf16 (%p263_p7), %v277_v13, %v276_v11  ;;  %v289_v17 = vpack.c.bf16 (%p263_p7), %v279_v15, %v278_v14  ;;  %v280_v18 = vld [vmem:[#allocation10 + $0x60] sm:$0xff] (%p263_p7)  ;;  %v281_v19 = vld [vmem:[#allocation10 + $0x68] sm:$0xff] (%p263_p7) }
  0x73   : > { %v282_v20 = vld [vmem:[#allocation10 + $0x70] sm:$0xff] (%p263_p7)  ;;  %295 = vst [vmem:[#allocation2 + $0x18] sm:$0xff] (%p263_p7), %v287_v12  ;;  %v290_v21 = vpack.c.bf16 (%p263_p7), %v281_v19, %v280_v18  ;;  %v283_v22 = vld [vmem:[#allocation10 + $0x78] sm:$0xff] (%p263_p7) }
  0x74   : > { %296 = vst [vmem:[#allocation2 + $0x20] sm:$0xff] (%p263_p7), %v288_v16  ;;  %297 = vst [vmem:[#allocation2 + $0x28] sm:$0xff] (%p263_p7), %v289_v17  ;;  %v291_v23 = vpack.c.bf16 (%p263_p7), %v283_v22, %v282_v20 }
  0x75   : > { %298 = vst [vmem:[#allocation2 + $0x30] sm:$0xff] (%p263_p7), %v290_v21 }
  0x76   : > { %299 = vst [vmem:[#allocation2 + $0x38] sm:$0xff] %v291_v23 }
  0x77 PF: > { %v1073_v26 = vld [vmem:[#allocation5] sm:$0xff]   ;;  %v1082_v31 = vld [vmem:[%s1435_s27 + $0x8] sm:$0xff]   ;;  %v1083_v32 = vld [vmem:[%s1435_s27 + $0x10] sm:$0xff]   ;;  %p1488_p1 = scmp.eq.s32.totalorder %s860_s21, 2 }
  0x78   : > { %945 = vmatprep.mubr.bf16.mxu0 %v1073_v26  ;;  %v1081_v30 = vld [vmem:[%s1435_s27] sm:$0xff]   ;;  %v1084_v34 = vld [vmem:[%s1435_s27 + $0x18] sm:$0xff]   ;;  %v1086_v38 = vld [vmem:[%s1435_s27 + $0x28] sm:$0xff]  }
  0x79   : > { %v356_v24 = vld [vmem:[#allocation2] sm:$0xff]  ;;  %961 = vmatprep.subr.bf16.mxu1 %v1081_v30  ;;  %v1074_v39 = vld [vmem:[#allocation5 + $0x8] sm:$0xff]   ;;  %v1075_v40 = vld [vmem:[#allocation5 + $0x10] sm:$0xff]  }
  0x7a   : > { %v357_v25 = vld [vmem:[#allocation2 + $0x8] sm:$0xff]  ;;  %929 = vmatprep.subr.bf16.mxu0 %v356_v24  ;;  %v358_v27 = vld [vmem:[#allocation2 + $0x10] sm:$0xff]  ;;  %962 = vmatpush3.bf16.msra.mxu1 %v1081_v30  ;;  %v1085_v36 = vld [vmem:[%s1435_s27 + $0x20] sm:$0xff]  }
  0x7b   : > { %930 = vmatpush3.bf16.msra.mxu0 %v356_v24  ;;  %v359_v28 = vld [vmem:[#allocation2 + $0x18] sm:$0xff]  ;;  %963 = vmatprep.subr.bf16.mxu1 %v1082_v31  ;;  %v1087_v41 = vld [vmem:[%s1435_s27 + $0x30] sm:$0xff]   ;;  %v1077_v43 = vld [vmem:[#allocation5 + $0x20] sm:$0xff]  }
  0x7c   : > { %931 = vmatprep.subr.bf16.mxu0 %v357_v25  ;;  %v360_v29 = vld [vmem:[#allocation2 + $0x20] sm:$0xff]  ;;  %v361_v33 = vld [vmem:[#allocation2 + $0x28] sm:$0xff]  ;;  %v1076_v42 = vld [vmem:[#allocation5 + $0x18] sm:$0xff]  }
  0x7d   : > { %v362_v35 = vld [vmem:[#allocation2 + $0x30] sm:$0xff]  ;;  %v363_v37 = vld [vmem:[#allocation2 + $0x38] sm:$0xff]  ;;  %v1078_v44 = vld [vmem:[#allocation5 + $0x28] sm:$0xff]  }
  0x7e   : > { %964 = vmatpush3.bf16.msra.mxu1 %v1082_v31  ;;  %v1079_v45 = vld [vmem:[#allocation5 + $0x30] sm:$0xff]   ;;  %v1080_v46 = vld [vmem:[#allocation5 + $0x38] sm:$0xff]   ;;  %v880_v8 = vld [vmem:[%s237_s9] ss:$0 sm:$0xff] }
  0x7f   : > { %932 = vmatpush3.bf16.msra.mxu0 %v357_v25  ;;  %965 = vmatprep.subr.bf16.mxu1 %v1083_v32  ;;  %v1088_v47 = vld [vmem:[%s1435_s27 + $0x38] sm:$0xff]   ;;  %s1268_s27 = smov [#allocation10]  }
  0x80   : > { %933 = vmatprep.subr.bf16.mxu0 %v358_v27  ;;  %s760_s22 = sshll.u32 %s1268_s27, 4  ;;  %s761_s22 = int_to_ptr.vmem [resolvable:$true] %s760_s22 }
  0x81   : > { %s1173_s11 = scalar_lea.vmem %s761_s22, 2048  ;;  %p1180_p9 = scmp.lt.s32.totalorder %s761_s22, %s761_s22 }
  0x82   : > { %966 = vmatpush3.bf16.msra.mxu1 %v1083_v32  ;;  %p1174_p4 = scmp.ne.s32.totalorder %s761_s22, %s1173_s11  ;;  %p1181_p10 = scmp.lt.s32.totalorder %s1173_s11, %s1173_s11 }
  0x83   : > { %934 = vmatpush3.bf16.msra.mxu0 %v358_v27  ;;  %967 = vmatprep.subr.bf16.mxu1 %v1084_v34 }
  0x84   : > { %935 = vmatprep.subr.bf16.mxu0 %v359_v28  ;;  %p1175_p5 = pnand %p1174_p4, %p1488_p1  ;;  %p1182_p11 = por %p1181_p10, %p1180_p9 }
  0x86   : > { %968 = vmatpush3.bf16.msra.mxu1 %v1084_v34  ;;  %p1176_p8 = pneg %p1175_p5 }
  0x87   : > { %936 = vmatpush3.bf16.msra.mxu0 %v359_v28  ;;  %969 = vmatprep.subr.bf16.mxu1 %v1085_v36 }
  0x88   : > { %937 = vmatprep.subr.bf16.mxu0 %v360_v29  ;;  %p1183_p13 = pnand %p1182_p11, %p1176_p8 }
  0x8a   : > { %970 = vmatpush3.bf16.msra.mxu1 %v1085_v36 }
  0x8b   : > { %938 = vmatpush3.bf16.msra.mxu0 %v360_v29  ;;  %971 = vmatprep.subr.bf16.mxu1 %v1086_v38 }
  0x8c   : > { %939 = vmatprep.subr.bf16.mxu0 %v361_v33 }
  0x8e   : > { %972 = vmatpush3.bf16.msra.mxu1 %v1086_v38 }
  0x8f   : > { %940 = vmatpush3.bf16.msra.mxu0 %v361_v33  ;;  %973 = vmatprep.subr.bf16.mxu1 %v1087_v41 }
  0x90   : > { %941 = vmatprep.subr.bf16.mxu0 %v362_v35 }
  0x92   : > { %974 = vmatpush3.bf16.msra.mxu1 %v1087_v41 }
  0x93   : > { %942 = vmatpush3.bf16.msra.mxu0 %v362_v35  ;;  %975 = vmatprep.subr.bf16.mxu1 %v1088_v47 }
  0x94   : > { %943 = vmatprep.subr.bf16.mxu0 %v363_v37 }
  0x96   : > { %976 = vmatpush3.bf16.msra.mxu1 %v1088_v47 }
  0x97   : > { %944 = vmatpush3.bf16.msra.mxu0 %v363_v37 }
  0x9a   : > { %946 = vmatmul.mubr.bf16.vlgmr.msra.gmra.mrb[0].mxu0 %v1074_v39 }
  0x9b   : > { %949 = vmatprep.mubr.bf16.mxu0 %v1075_v40 }
  0xa2   : > { %950 = vmatmul.mubr.bf16.gmra.mrb[4].mxu0 %v1076_v42 }
  0xa3   : > { %953 = vmatprep.mubr.bf16.mxu0 %v1077_v43 }
  0xaa   : > { %954 = vmatmul.mubr.bf16.gmra.mrb[8].mxu0 %v1078_v44 }
  0xab   : > { %957 = vmatprep.mubr.bf16.mxu0 %v1079_v45 }
  0xb2   : > { %958 = vmatmul.mubr.bf16.gmra.mrb[12].mxu0 %v1080_v46 }
 0x16d   : > { %v947_v48 = vpop.f32.mrb[0].mxu0 }
 0x16e   : > { %v446_v49 = vpop.f32.mrb[1].mxu0 }
 0x16f   : > { %v948_v50 = vpop.f32.mrb[2].mxu0 }
 0x170   : > { %v561_v51 = vpack.c.bf16 %v948_v50, %v947_v48  ;;  %v449_v52 = vpop.f32.mrb[3].mxu0 }
 0x171   : > { %v560_v53 = vpack.c.bf16 %v449_v52, %v446_v49 }
 0x173   : > { %977 = vmatprep.mubr.bf16.mxu1 %v560_v53 }
 0x174   : > { %978 = vmatmul.mubr.bf16.vlgmr.msra.gmra.mrb[0].mxu1 %v561_v51 }
 0x175   : > { %v951_v54 = vpop.f32.mrb[4].mxu0 }
 0x176   : > { %v462_v55 = vpop.f32.mrb[5].mxu0 }
 0x177   : > { %v952_v56 = vpop.f32.mrb[6].mxu0 }
 0x178   : > { %v563_v57 = vpack.c.bf16 %v952_v56, %v951_v54  ;;  %v465_v58 = vpop.f32.mrb[7].mxu0 }
 0x179   : > { %v562_v59 = vpack.c.bf16 %v465_v58, %v462_v55 }
 0x17b   : > { %981 = vmatprep.mubr.bf16.mxu1 %v562_v59 }
 0x17c   : > { %982 = vmatmul.mubr.bf16.gmra.mrb[4].mxu1 %v563_v57 }
 0x17d   : > { %v955_v60 = vpop.f32.mrb[8].mxu0 }
 0x17e   : > { %v478_v61 = vpop.f32.mrb[9].mxu0 }
 0x17f   : > { %v956_v62 = vpop.f32.mrb[10].mxu0 }
 0x180   : > { %v565_v63 = vpack.c.bf16 %v956_v62, %v955_v60  ;;  %v481_v0 = vpop.f32.mrb[11].mxu0 }
 0x181   : > { %v564_v1 = vpack.c.bf16 %v481_v0, %v478_v61 }
 0x183   : > { %985 = vmatprep.mubr.bf16.mxu1 %v564_v1 }
 0x184   : > { %986 = vmatmul.mubr.bf16.gmra.mrb[8].mxu1 %v565_v63 }
 0x185   : > { %v959_v2 = vpop.f32.mrb[12].mxu0 }
 0x186   : > { %v494_v3 = vpop.f32.mrb[13].mxu0 }
 0x187   : > { %v960_v4 = vpop.f32.mrb[14].mxu0 }
 0x188   : > { %v567_v5 = vpack.c.bf16 %v960_v4, %v959_v2  ;;  %v497_v6 = vpop.f32.mrb[15].mxu0 }
 0x189   : > { %v566_v7 = vpack.c.bf16 %v497_v6, %v494_v3 }
 0x18b   : > { %989 = vmatprep.mubr.bf16.mxu1 %v566_v7 }
 0x18c   : > { %990 = vmatmul.mubr.bf16.gmra.mrb[12].mxu1 %v567_v5 }
 0x247   : > { %v979_v9 = vpop.f32.mrb[0].mxu1 }
 0x248   : > { %v682_v10 = vadd.f32 %v979_v9, %v880_v8  ;;  %v673_v11 = vpop.f32.mrb[1].mxu1 }
 0x249   : > { %v674_v12 = vadd.f32 %v880_v8, %v673_v11  ;;  %v980_v13 = vpop.f32.mrb[2].mxu1 }
 0x24a   : > { %740 = vst [vmem:[#allocation10 + $0x10] sm:$0xff] %v682_v10  ;;  %v685_v14 = vadd.f32 %v980_v13, %v880_v8  ;;  %v676_v15 = vpop.f32.mrb[3].mxu1 }
 0x24b   : > { %738 = vst [vmem:[#allocation10] sm:$0xff] %v674_v12  ;;  %v677_v16 = vadd.f32 %v880_v8, %v676_v15 }
 0x24c   : > { %741 = vst [vmem:[#allocation10 + $0x18] sm:$0xff] %v685_v14 }
 0x24d   : > { %739 = vst [vmem:[#allocation10 + $0x8] sm:$0xff] %v677_v16 }
 0x24f   : > { %v983_v17 = vpop.f32.mrb[4].mxu1 }
 0x250   : > { %v698_v18 = vadd.f32 %v983_v17, %v880_v8  ;;  %v689_v19 = vpop.f32.mrb[5].mxu1 }
 0x251   : > { %v690_v20 = vadd.f32 %v880_v8, %v689_v19  ;;  %v984_v21 = vpop.f32.mrb[6].mxu1 }
 0x252   : > { %744 = vst [vmem:[#allocation10 + $0x30] sm:$0xff] %v698_v18  ;;  %v701_v22 = vadd.f32 %v984_v21, %v880_v8  ;;  %v692_v23 = vpop.f32.mrb[7].mxu1 }
 0x253   : > { %742 = vst [vmem:[#allocation10 + $0x20] sm:$0xff] %v690_v20  ;;  %v693_v24 = vadd.f32 %v880_v8, %v692_v23 }
 0x254   : > { %745 = vst [vmem:[#allocation10 + $0x38] sm:$0xff] %v701_v22 }
 0x255   : > { %743 = vst [vmem:[#allocation10 + $0x28] sm:$0xff] %v693_v24 }
 0x257   : > { %v987_v25 = vpop.f32.mrb[8].mxu1 }
 0x258   : > { %v714_v26 = vadd.f32 %v987_v25, %v880_v8  ;;  %v705_v27 = vpop.f32.mrb[9].mxu1 }
 0x259   : > { %v706_v28 = vadd.f32 %v880_v8, %v705_v27  ;;  %v988_v29 = vpop.f32.mrb[10].mxu1 }
 0x25a   : > { %748 = vst [vmem:[#allocation10 + $0x50] sm:$0xff] %v714_v26  ;;  %v717_v30 = vadd.f32 %v988_v29, %v880_v8  ;;  %v708_v31 = vpop.f32.mrb[11].mxu1 }
 0x25b   : > { %746 = vst [vmem:[#allocation10 + $0x40] sm:$0xff] %v706_v28  ;;  %v709_v32 = vadd.f32 %v880_v8, %v708_v31 }
 0x25c   : > { %749 = vst [vmem:[#allocation10 + $0x58] sm:$0xff] %v717_v30 }
 0x25d   : > { %747 = vst [vmem:[#allocation10 + $0x48] sm:$0xff] %v709_v32 }
 0x25f   : > { %v991_v33 = vpop.f32.mrb[12].mxu1 }
 0x260   : > { %v730_v34 = vadd.f32 %v991_v33, %v880_v8  ;;  %v721_v35 = vpop.f32.mrb[13].mxu1 }
 0x261   : > { %v722_v36 = vadd.f32 %v880_v8, %v721_v35  ;;  %v992_v37 = vpop.f32.mrb[14].mxu1 }
 0x262   : > { %752 = vst [vmem:[#allocation10 + $0x70] sm:$0xff] %v730_v34  ;;  %v733_v38 = vadd.f32 %v992_v37, %v880_v8  ;;  %v724_v39 = vpop.f32.mrb[15].mxu1 }
 0x263   : > { %750 = vst [vmem:[#allocation10 + $0x60] sm:$0xff] %v722_v36  ;;  %v725_v40 = vadd.f32 %v880_v8, %v724_v39 }
 0x264   : > { %753 = vst [vmem:[#allocation10 + $0x78] sm:$0xff] %v733_v38 }
 0x265   : > { %751 = vst [vmem:[#allocation10 + $0x68] sm:$0xff] %v725_v40 }
 0x266   : > { %1186 = shalt.err (!%p1183_p13)
}
 0x267   : > { %s1187_s26 = scalar_lea.hbm %s1536_s4, 2048 }
 0x268   : > { %p1188_p2 = scmp.ne.s32.totalorder %s1536_s4, %s1187_s26  ;;  %p1193_p0 = scmp.lt.u32.totalorder %s1187_s26, %s1536_s4 }
 0x26a   : > { %p1189_p3 = pnand %p1188_p2, %p1488_p1 }
 0x26c   : > { %p1190_p12 = pneg %p1189_p3 }
 0x26e   : > { %p1195_p6 = pnand %p1193_p0, %p1190_p12 }
 0x270   : > { %1198 = shalt.err (!%p1195_p6)
}
 0x271   : > { %s1269_s6 = smov 128   ;;  %s1270_s29 = smov 8  }
 0x272   : > { %1002 = dma.vmem_to_hbm [thread:$0]  (%p1488_p1), %s761_s22, 2048, %s1536_s4, [#allocation7], %s1269_s6, %s1269_s6, %s1270_s29  }
 0x273   : > { %1236 = dma.done.wait (%p1488_p1), [#allocation7], 2048  }
 0x274   : > { %1238 = vsyncadd (%p1488_p1), [#allocation7], 4294965248 }
 0x275 PF: > { %s19_s20 = sadd.s32 1, %s1261_s20   ;;  %s1550_s15 = smov %s1245_s16 }
 0x276   : > { %p16_p7 = scmp.ge.s32.totalorder %s19_s20, 5   ;;  %s1551_s16 = smov %s1249_s17 }
 0x277   : > { %s1552_s17 = smov %s1384_s5  ;;  %s1553_s18 = smov %s1257_s19 }
 0x278   : > { %s1554_s19 = smov %s1556_s28  ;;  %18 = sbr.rel (!%p16_p7) target bundleno = 6 (0x6), region = 100 }
 0x27f   :  { %776 = vsyncpa [#allocation6], 1 }
 0x280   :  { %778 = vsyncpa [#allocation6 + $0x1], 1 }
 0x281   :  { %779 = vsyncpa [#allocation9], 1 }
 0x282   :  { %781 = vsyncpa [#allocation9 + $0x1], 1 }
 0x283   :  { %782 = vsyncpa [#allocation7], 1 }
 0x284   :  { %784 = vsyncpa [#allocation7 + $0x1], 1 }
 0x285   :  { %785 = vsyncmov [#allocation4] }
 0x288   :  { %s786_s14 = vpop.sfrf %785 }
 0x289   :  { %p893_p1 = scmp.ne.s32.totalorder %s786_s14, 0 }
 0x28b   :  { %790 = shalt.err (%p893_p1)  }

</bundles_post_ra>
